<compile_context>
chip_gen: v6e
topology: v6e:2x2x1
jax: 0.10.0
libtpu: 0.0.40
codegen_flags: <defaults>
</compile_context>

<pallas_src>
import functools
import math

import jax
import jax.numpy as jnp
from jax.experimental import pallas as pl
from jax.experimental.pallas import tpu as pltpu

_VMEM_SLACK = 4 * 1024 * 1024  # Mosaic internal scratch / layout padding headroom


# ----------------------------------------------------------------------------- kernel
def _group_linear_kernel(x_ref, w_ref, b_ref, o_ref, *, compute_dtype):
    # x_ref: (tb, D)  w_ref: (D, tn)  b_ref: (1, tn) f32  o_ref: (tb, tn)
    x = x_ref[...]
    w = w_ref[...]
    if compute_dtype is not None:
        # In-kernel cast on the VPU (hidden under the MXU): keeps x/W in their
        # stored dtype in HBM, so the bf16 path reads 4 B/elem instead of 8.
        x = x.astype(compute_dtype)
        w = w.astype(compute_dtype)
    acc = jnp.dot(x, w, preferred_element_type=jnp.float32)
    o_ref[...] = (acc + b_ref[...]).astype(o_ref.dtype)


# ----------------------------------------------------------------------------- planning
def _vmem_budget_bytes():
    try:
        phys = int(pltpu.get_tpu_info().vmem_capacity_bytes)
    except Exception:
        phys = 64 * 1024 * 1024  # conservative: v7x per-TC VMEM
    return (phys * 3) // 4       # ~96 MiB on v5e/v6e (128 MiB), ~48 MiB on v7x


def _choose_tb(B, block_b):
    if B <= block_b:
        return B                          # full dim -> always a legal block
    for align in (256, 128, 8):           # 256-row passes feed the v6e/v7x MXU fully
        if block_b >= align:
            return (block_b // align) * align
    return 8


def _plan_tiles(B, G, D, x_item, w_item, o_item, cd_item, block_b, block_n, budget):
    """Pick (tb, tn, nn, nb, order, vmem_need) under the VMEM budget.

    order == "b_inner": grid (g, n, b), weight/bias resident across batch tiles.
    order == "n_inner": grid (g, b, n), x tile resident across output-N tiles.
    """
    tn_cands = [t for t in range(128, D + 1, 128) if D % t == 0]
    if block_n is not None:
        capped = [t for t in tn_cands if t <= max(block_n, 128)]
        tn_cands = capped or tn_cands[:1]
    tn_cands.sort(reverse=True)

    tb0 = _choose_tb(B, block_b)
    tb_cands = [tb0] + [t for t in (256, 128, 64, 32, 16, 8) if t < tb0]

    for tb in tb_cands:
        nb = pl.cdiv(B, tb)
        best = None
        for tn in tn_cands:
            nn = D // tn
            for order in ("b_inner", "n_inner"):
                w_bufs = 1 if order == "b_inner" else 2   # resident -> single buffer
                need = (2 * tb * D * x_item               # x (double buffered)
                        + w_bufs * D * tn * w_item        # weight
                        + w_bufs * 8 * tn * 4             # bias (pads to 8 sublanes)
                        + 2 * tb * tn * o_item            # out (double buffered)
                        + tb * tn * 4)                    # f32 acc temp
                if cd_item is not None:
                    need += (tb * D + D * tn) * cd_item   # in-kernel cast temps
                if need + _VMEM_SLACK > budget:
                    continue
                # Extra HBM traffic beyond one pass over x and one over W.
                extra = ((nn - 1) * B * G * D * x_item if order == "b_inner"
                         else (nb - 1) * G * D * D * w_item)
                key = (extra, -tn)
                if best is None or key < best[0]:
                    best = (key, tb, tn, nn, nb, order, need)
        if best is not None:
            return best[1:]
    return None


# ----------------------------------------------------------------------------- pallas call
def _group_linear(x2, weight, bias, *, block_b, block_n, compute_dtype, out_dtype):
    """x2: (B, G*D) flat, groups contiguous; weight: (G, D, D); bias: (G, D)."""
    B, GD = x2.shape
    G, D, D2 = weight.shape
    assert D == D2 and GD == G * D and D % 128 == 0

    bias3 = bias.reshape(G, 1, D).astype(jnp.float32)

    x_item = jnp.dtype(x2.dtype).itemsize
    w_item = jnp.dtype(weight.dtype).itemsize
    o_item = jnp.dtype(out_dtype).itemsize
    cd_item = None if compute_dtype is None else jnp.dtype(compute_dtype).itemsize

    budget = _vmem_budget_bytes()
    plan = _plan_tiles(B, G, D, x_item, w_item, o_item, cd_item,
                       block_b, block_n, budget)
    if plan is None:
        # TODO(synk): K-axis (contraction) tiling with an f32 accumulator scratch
        # would bound VMEM independently of D; until then huge-D falls back to XLA.
        return None
    tb, tn, nn, nb, order, need = plan

    vmem_limit = int(min(budget, max(need + _VMEM_SLACK, 32 * 1024 * 1024)))

    kernel = functools.partial(_group_linear_kernel, compute_dtype=compute_dtype)

    cost = pl.CostEstimate(
        flops=2 * B * G * D * D,
        transcendentals=0,
        bytes_accessed=B * GD * (x_item + o_item) + G * D * D * w_item + G * D * 4,
    )

    if order == "b_inner":
        grid = (G, nn, nb)
        x_map = lambda g, n, b: (b, g)
        w_map = lambda g, n, b: (g, 0, n)
        o_map = lambda g, n, b, _nn=nn: (b, g * _nn + n)
        resident_w = True      # weight/bias blocks constant across innermost b axis
    else:
        grid = (G, nb, nn)
        x_map = lambda g, b, n: (b, g)
        w_map = lambda g, b, n: (g, 0, n)
        o_map = lambda g, b, n, _nn=nn: (b, g * _nn + n)
        resident_w = False     # x block constant across innermost n axis instead

    def _call(single_buffer_resident):
        wb_kw = {}
        if single_buffer_resident and resident_w:
            # Resident blocks are never re-fetched during the innermost loop,
            # so one buffer suffices; the saved VMEM is what lets tn grow.
            wb_kw = dict(pipeline_mode=pl.Buffered(1))
        return pl.pallas_call(
            kernel,
            out_shape=jax.ShapeDtypeStruct((B, GD), out_dtype),
            grid_spec=pltpu.PrefetchScalarGridSpec(
                num_scalar_prefetch=0,
                grid=grid,
                in_specs=[
                    # x tile: rows b*tb.., group g's contiguous D columns.
                    pl.BlockSpec((tb, D), x_map),
                    # per-group weight, output columns n*tn..
                    pl.BlockSpec((None, D, tn), w_map, **wb_kw),
                    # per-group bias slice.
                    pl.BlockSpec((None, 1, tn), w_map, **wb_kw),
                ],
                out_specs=pl.BlockSpec((tb, tn), o_map),
            ),
            compiler_params=pltpu.CompilerParams(
                dimension_semantics=("parallel", "parallel", "parallel"),
                vmem_limit_bytes=vmem_limit,
            ),
            cost_estimate=cost,
        )(x2, weight, bias3)

    try:
        return _call(True)
    except Exception:
        # pl.Buffered / pipeline_mode unavailable or rejected on this JAX/Mosaic
        # version: retry with default double-buffering (correctness identical).
        return _call(False)


# ----------------------------------------------------------------------------- wrapper
def _conv2d_einsum(x, weight, bias, nf, nx, transpose=False):
    """Pure-XLA path mirroring the PyTorch forward exactly (also used as reference)."""
    size_out = x.shape[:-1] + (nf * nx,)
    xg = x.reshape(-1, nf, nx)
    if not transpose:
        out = jnp.einsum('bij,ijk->bik', xg, weight) + bias
    else:
        out = jnp.einsum('bjk,kji->bik', xg, weight) + bias.T[None]
    return out.reshape(size_out)


def conv2d_forward(x, weight, bias, nf, nx, transpose=False, *,
                   compute_dtype=None, block_b=256, block_n=None,
                   use_pallas=None, min_pallas_elems=1 << 18):
    """JAX/Pallas equivalent of Conv2D.forward.

    compute_dtype: optional MXU input dtype (e.g. jnp.bfloat16); cast happens
    inside the kernel, accumulation stays f32.  On v5e pass bfloat16 explicitly
    for the 2-3x MXU speedup (not defaulted, to preserve f32 numerics).
    block_n: optional cap on the output-N tile; None = VMEM-budget driven.
    """
    size_out = x.shape[:-1] + (nf * nx,)
    G, D = (nx, nf) if transpose else (nf, nx)
    B = math.prod(x.shape[:-1]) if x.ndim > 1 else 1

    lane_ok = (D % 128 == 0) and D > 0
    if not lane_ok:
        # Lane-sparse per-group width wastes most of the 128 lanes and forces
        # masked partial stores; XLA handles these shapes better.
        return _conv2d_einsum(x, weight, bias, nf, nx, transpose)
    if use_pallas is None:
        # Small-problem fast path: per-grid-step overhead dominates at toy sizes.
        use_pallas = (B * G * D) >= min_pallas_elems
    if not use_pallas:
        return _conv2d_einsum(x, weight, bias, nf, nx, transpose)

    out_dtype = x.dtype
    kwargs = dict(block_b=block_b, block_n=block_n,
                  compute_dtype=compute_dtype, out_dtype=out_dtype)
    if not transpose:
        # Groups are already contiguous in the last dim -> no HBM transpose at all.
        x2 = x.reshape(-1, nf * nx)
        y2 = _group_linear(x2, weight, bias, **kwargs)
        if y2 is None:
            return _conv2d_einsum(x, weight, bias, nf, nx, transpose)
        return y2.reshape(size_out)
    else:
        # Group index (k over nx) is lane-strided in x's last dim; one XLA swap on
        # each side keeps the kernel lane-dense (per-group width D = nf).
        xg = jnp.swapaxes(x.reshape(-1, nf, nx), -1, -2)          # (B, nx, nf)
        y2 = _group_linear(xg.reshape(-1, nx * nf), weight, bias, **kwargs)
        if y2 is None:
            return _conv2d_einsum(x, weight, bias, nf, nx, transpose)
        out = jnp.swapaxes(y2.reshape(-1, nx, nf), -1, -2)        # (B, nf, nx)
        # TODO(synk): fold these two swapaxes into the kernel (lane-strided group
        # gather/scatter or in-tile XLU transpose) to remove ~4 extra HBM passes.
        return out.reshape(size_out)


# ----------------------------------------------------------------------------- test
if __name__ == "__main__":
    key = jax.random.PRNGKey(0)
    k1, k2, k3, k4, k5, k6 = jax.random.split(key, 6)
    lead = (2, 8)   # leading dims; last dim must be nf*nx

    # ---- case 1: transpose=False (nf=4 groups of nx=128 features) ----
    nf, nx = 4, 128
    x = jax.random.normal(k1, lead + (nf * nx,), dtype=jnp.float32)
    w = jnp.stack([jnp.eye(nx, dtype=jnp.float32)] * nf) \
        + 0.02 * jax.random.normal(k2, (nf, nx, nx), dtype=jnp.float32)
    b = 0.02 * jax.random.normal(k3, (nf, nx), dtype=jnp.float32)

    out = conv2d_forward(x, w, b, nf, nx, transpose=False, use_pallas=True)
    jax.block_until_ready(out)
    ref = _conv2d_einsum(x, w, b, nf, nx, False)
    assert out.shape == lead + (nf * nx,)
    assert jnp.allclose(out, ref, atol=1e-4, rtol=1e-4)

    # ---- case 1b: bf16 compute path (in-kernel cast, f32 accumulation) ----
    out_bf = conv2d_forward(x, w, b, nf, nx, transpose=False, use_pallas=True,
                            compute_dtype=jnp.bfloat16)
    jax.block_until_ready(out_bf)
    assert out_bf.dtype == x.dtype
    assert jnp.allclose(out_bf, ref, atol=5e-2, rtol=5e-2)

    # ---- case 2: transpose=True path (nx=4 groups of nf=128 features) ----
    nf_t, nx_t = 128, 4
    x_t = jax.random.normal(k4, lead + (nf_t * nx_t,), dtype=jnp.float32)
    w_t = jnp.stack([jnp.eye(nf_t, dtype=jnp.float32)] * nx_t) \
        + 0.02 * jax.random.normal(k5, (nx_t, nf_t, nf_t), dtype=jnp.float32)
    b_t = 0.02 * jax.random.normal(k6, (nx_t, nf_t), dtype=jnp.float32)

    out_t = conv2d_forward(x_t, w_t, b_t, nf_t, nx_t, transpose=True, use_pallas=True)
    jax.block_until_ready(out_t)
    ref_t = _conv2d_einsum(x_t, w_t, b_t, nf_t, nx_t, True)
    assert out_t.shape == lead + (nf_t * nx_t,)
    assert jnp.allclose(out_t, ref_t, atol=1e-4, rtol=1e-4)

    # ---- case 3: multi-tile (ragged) batch; weight resident across b tiles ----
    nf3, nx3 = 2, 128
    B3 = 210   # block_b=64 -> 4 batch tiles, last one ragged
    x3 = jax.random.normal(k2, (B3, nf3 * nx3), dtype=jnp.float32)
    w3 = 0.05 * jax.random.normal(k3, (nf3, nx3, nx3), dtype=jnp.float32)
    b3 = 0.05 * jax.random.normal(k4, (nf3, nx3), dtype=jnp.float32)
    out3 = conv2d_forward(x3, w3, b3, nf3, nx3, transpose=False,
                          use_pallas=True, block_b=64)
    jax.block_until_ready(out3)
    ref3 = _conv2d_einsum(x3, w3, b3, nf3, nx3, False)
    assert jnp.allclose(out3, ref3, atol=2e-4, rtol=2e-4)

    # ---- case 4: multiple output-N tiles; exercises the n-innermost grid order ----
    nf4, nx4 = 2, 256
    B4 = 64
    x4 = jax.random.normal(k5, (B4, nf4 * nx4), dtype=jnp.float32)
    w4 = 0.05 * jax.random.normal(k6, (nf4, nx4, nx4), dtype=jnp.float32)
    b4 = 0.05 * jax.random.normal(k1, (nf4, nx4), dtype=jnp.float32)
    out4 = conv2d_forward(x4, w4, b4, nf4, nx4, transpose=False,
                          use_pallas=True, block_n=128)
    jax.block_until_ready(out4)
    ref4 = _conv2d_einsum(x4, w4, b4, nf4, nx4, False)
    assert jnp.allclose(out4, ref4, atol=2e-4, rtol=2e-4)

    # ---- auto-dispatch: tiny problem routes to the XLA einsum fast path ----
    out_small = conv2d_forward(x, w, b, nf, nx, transpose=False)
    assert jnp.allclose(out_small, ref, atol=1e-6, rtol=1e-6)

    print("KERNEL_OK")
</pallas_src>

<mosaic_0001>
module attributes {stable_mosaic.version = 11 : i64} {
  func.func @_group_linear_kernel(%arg0: i32, %arg1: i32, %arg2: i32, %arg3: memref<16x128xf32, #tpu.memory_space<vmem>>, %arg4: memref<1x128x128xf32, #tpu.memory_space<vmem>>, %arg5: memref<1x1x128xf32, #tpu.memory_space<vmem>>, %arg6: memref<16x128xf32, #tpu.memory_space<vmem>>) attributes {dimension_semantics = [#tpu.dimension_semantics<parallel>, #tpu.dimension_semantics<parallel>, #tpu.dimension_semantics<parallel>], iteration_bounds = array<i64: 4, 1, 1>, scalar_prefetch = 0 : i64, scratch_operands = 0 : i64, tpu.core_type = #tpu.core_type<tc>, window_params = [{transform_indices = @transform_0, window_bounds = array<i64: 16, 128>}, {pipeline_mode = #tpu.pipeline_mode<synchronous>, transform_indices = @transform_1, window_bounds = array<i64: 1, 128, 128>}, {pipeline_mode = #tpu.pipeline_mode<synchronous>, transform_indices = @transform_2, window_bounds = array<i64: 1, 1, 128>}, {transform_indices = @transform_3, window_bounds = array<i64: 16, 128>}]} {
    %c0 = arith.constant 0 : index
    %c0_0 = arith.constant 0 : index
    %0 = vector.load %arg3[%c0, %c0_0] : memref<16x128xf32, #tpu.memory_space<vmem>>, vector<16x128xf32>
    %c0_1 = arith.constant 0 : index
    %c0_2 = arith.constant 0 : index
    %c0_3 = arith.constant 0 : index
    %1 = vector.load %arg4[%c0_1, %c0_2, %c0_3] : memref<1x128x128xf32, #tpu.memory_space<vmem>>, vector<1x128x128xf32>
    %2 = vector.shape_cast %1 : vector<1x128x128xf32> to vector<128x128xf32>
    %cst = arith.constant dense<0.000000e+00> : vector<16x128xf32>
    %3 = tpu.matmul %0, %2, %cst {dimension_numbers = #tpu.dot_dimension_numbers<[1], [0], [0], [1], [0, 0, 1, 1], [], []>} : vector<16x128xf32>, vector<128x128xf32>, vector<16x128xf32> -> vector<16x128xf32>
    %c0_4 = arith.constant 0 : index
    %c0_5 = arith.constant 0 : index
    %c0_6 = arith.constant 0 : index
    %4 = vector.load %arg5[%c0_4, %c0_5, %c0_6] : memref<1x1x128xf32, #tpu.memory_space<vmem>>, vector<1x1x128xf32>
    %5 = vector.shape_cast %4 : vector<1x1x128xf32> to vector<1x128xf32>
    %6 = vector.broadcast %5 : vector<1x128xf32> to vector<16x128xf32>
    %7 = arith.addf %3, %6 : vector<16x128xf32>
    %c0_7 = arith.constant 0 : index
    %c0_8 = arith.constant 0 : index
    %8 = vector.load %arg6[%c0_7, %c0_8] : memref<16x128xf32, #tpu.memory_space<vmem>>, vector<16x128xf32>
    tpu.vector_store %arg6[%c0_7, %c0_8], %7 {strides = array<i32>} : memref<16x128xf32, #tpu.memory_space<vmem>>, vector<16x128xf32>,
    return
  }
  func.func @transform_0(%arg0: i32, %arg1: i32, %arg2: i32) -> (i32, i32) {
    %c0_i32 = arith.constant 0 : i32
    return %arg2, %arg0 : i32, i32
  }
  func.func @transform_1(%arg0: i32, %arg1: i32, %arg2: i32) -> (i32, i32, i32) {
    %c0_i32 = arith.constant 0 : i32
    %c0_i32_0 = arith.constant 0 : i32
    return %arg0, %c0_i32, %arg1 : i32, i32, i32
  }
  func.func @transform_2(%arg0: i32, %arg1: i32, %arg2: i32) -> (i32, i32, i32) {
    %c0_i32 = arith.constant 0 : i32
    %c0_i32_0 = arith.constant 0 : i32
    return %arg0, %c0_i32, %arg1 : i32, i32, i32
  }
  func.func @transform_3(%arg0: i32, %arg1: i32, %arg2: i32) -> (i32, i32) {
    %c1_i32 = arith.constant 1 : i32
    %0 = arith.muli %arg0, %c1_i32 : i32
    %1 = arith.addi %0, %arg1 : i32
    %c0_i32 = arith.constant 0 : i32
    return %arg2, %1 : i32, i32
  }
}

module attributes {stable_mosaic.version = 11 : i64} {
  func.func @_group_linear_kernel(%arg0: i32, %arg1: i32, %arg2: i32, %arg3: memref<16x128xf32, #tpu.memory_space<vmem>>, %arg4: memref<1x128x128xf32, #tpu.memory_space<vmem>>, %arg5: memref<1x1x128xf32, #tpu.memory_space<vmem>>, %arg6: memref<16x128xf32, #tpu.memory_space<vmem>>) attributes {dimension_semantics = [#tpu.dimension_semantics<parallel>, #tpu.dimension_semantics<parallel>, #tpu.dimension_semantics<parallel>], iteration_bounds = array<i64: 4, 1, 1>, scalar_prefetch = 0 : i64, scratch_operands = 0 : i64, tpu.core_type = #tpu.core_type<tc>, window_params = [{transform_indices = @transform_0, window_bounds = array<i64: 16, 128>}, {transform_indices = @transform_1, window_bounds = array<i64: 1, 128, 128>}, {transform_indices = @transform_2, window_bounds = array<i64: 1, 1, 128>}, {transform_indices = @transform_3, window_bounds = array<i64: 16, 128>}]} {
    %c0 = arith.constant 0 : index
    %c0_0 = arith.constant 0 : index
    %0 = vector.load %arg3[%c0, %c0_0] : memref<16x128xf32, #tpu.memory_space<vmem>>, vector<16x128xf32>
    %c0_1 = arith.constant 0 : index
    %c0_2 = arith.constant 0 : index
    %c0_3 = arith.constant 0 : index
    %1 = vector.load %arg4[%c0_1, %c0_2, %c0_3] : memref<1x128x128xf32, #tpu.memory_space<vmem>>, vector<1x128x128xf32>
    %2 = vector.shape_cast %1 : vector<1x128x128xf32> to vector<128x128xf32>
    %cst = arith.constant dense<0.000000e+00> : vector<16x128xf32>
    %3 = tpu.matmul %0, %2, %cst {dimension_numbers = #tpu.dot_dimension_numbers<[1], [0], [0], [1], [0, 0, 1, 1], [], []>} : vector<16x128xf32>, vector<128x128xf32>, vector<16x128xf32> -> vector<16x128xf32>
    %c0_4 = arith.constant 0 : index
    %c0_5 = arith.constant 0 : index
    %c0_6 = arith.constant 0 : index
    %4 = vector.load %arg5[%c0_4, %c0_5, %c0_6] : memref<1x1x128xf32, #tpu.memory_space<vmem>>, vector<1x1x128xf32>
    %5 = vector.shape_cast %4 : vector<1x1x128xf32> to vector<1x128xf32>
    %6 = vector.broadcast %5 : vector<1x128xf32> to vector<16x128xf32>
    %7 = arith.addf %3, %6 : vector<16x128xf32>
    %c0_7 = arith.constant 0 : index
    %c0_8 = arith.constant 0 : index
    %8 = vector.load %arg6[%c0_7, %c0_8] : memref<16x128xf32, #tpu.memory_space<vmem>>, vector<16x128xf32>
    tpu.vector_store %arg6[%c0_7, %c0_8], %7 {strides = array<i32>} : memref<16x128xf32, #tpu.memory_space<vmem>>, vector<16x128xf32>,
    return
  }
  func.func @transform_0(%arg0: i32, %arg1: i32, %arg2: i32) -> (i32, i32) {
    %c0_i32 = arith.constant 0 : i32
    return %arg2, %arg0 : i32, i32
  }
  func.func @transform_1(%arg0: i32, %arg1: i32, %arg2: i32) -> (i32, i32, i32) {
    %c0_i32 = arith.constant 0 : i32
    %c0_i32_0 = arith.constant 0 : i32
    return %arg0, %c0_i32, %arg1 : i32, i32, i32
  }
  func.func @transform_2(%arg0: i32, %arg1: i32, %arg2: i32) -> (i32, i32, i32) {
    %c0_i32 = arith.constant 0 : i32
    %c0_i32_0 = arith.constant 0 : i32
    return %arg0, %c0_i32, %arg1 : i32, i32, i32
  }
  func.func @transform_3(%arg0: i32, %arg1: i32, %arg2: i32) -> (i32, i32) {
    %c1_i32 = arith.constant 1 : i32
    %0 = arith.muli %arg0, %c1_i32 : i32
    %1 = arith.addi %0, %arg1 : i32
    %c0_i32 = arith.constant 0 : i32
    return %arg2, %1 : i32, i32
  }
}

</mosaic_0001>

<bundles_post_ra>
// kernel: tpu_custom_call.1
= control target key start
LH: loop header
LB: loop body
LE: loop exit
PB: predicated region body
PF: predicated region fallthrough
CT: control target
= control target key end

     0   :  { %8 = vsyncpa [#allocation3], 0  ;;  %s1085_s0 = inlined_call_operand.hbm [shape: f32[16,512], index: 0, kind: input, shape index: {}]   ;;  %s1086_s1 = inlined_call_operand.hbm [shape: f32[4,128,128], index: 1, kind: input, shape index: {}]   ;;  %s1087_s2 = inlined_call_operand.hbm [shape: f32[4,1,128], index: 2, kind: input, shape index: {}]   ;;  %s1088_s3 = inlined_call_operand.hbm [shape: f32[16,512], index: 3, kind: output, shape index: {}]  }
   0x1   :  { %10 = vsyncpa [#allocation3 + $0x1], 0 }
   0x2   :  { %11 = vsyncpa [#allocation6], 0 }
   0x3   :  { %12 = vsyncpa [#allocation4], 0 }
   0x4   :  { %14 = vsyncpa [#allocation4 + $0x1], 0  ;;  %s853_s12 = smov 0   ;;  %s855_s13 = smov 0  }
   0x5   :  { %s857_s14 = smov 0   ;;  %s859_s15 = smov 0  }
   0x6   :  { %s861_s16 = smov 0   ;;  %s863_s17 = smov 0  }
   0x7 LB: > { %s501_s18 = sadd.s32 4294967295, %s821_s17   ;;  %s502_s19 = sadd.s32 4294967294, %s821_s17   ;;  %s821_s17 = sphi %s863_s17, %s20_s17   ;;  %s817_s16 = sphi %s861_s16, %s1107_s16   ;;  %s813_s15 = sphi %s859_s15, %s1106_s15   ;;  %s809_s14 = sphi %s857_s14, %s1105_s14   ;;  %s805_s13 = sphi %s855_s13, %s1104_s13   ;;  %s801_s12 = sphi %s853_s12, %s1103_s12  }
   0x8   : > { %p61_p0 = scmp.ne.s32.totalorder %s805_s13, %s801_s12  ;;  %p62_p1 = scmp.eq.s32.totalorder %s501_s18, 0 }
   0x9   : > { %p887_p2 = scmp.eq.s32.totalorder %s501_s18, 3  ;;  %p151_p3 = scmp.eq.s32.totalorder %s502_s19, 3 }
   0xa   : > { %p891_p4 = por %p62_p1, %p61_p0  ;;  %p503_p5 = scmp.ge.s32.totalorder %s821_s17, 1 }
   0xb   : > { %s1092_s20 = scalar_select %p887_p2, 1, 0 }
   0xc   : > { %s1093_s21 = scalar_select %p891_p4, 1, 0 }
   0xd   : > { %p896_p6 = por %p151_p3, %p61_p0  ;;  %p158_p7 = scmp.lt.s32.totalorder %s821_s17, 5 }
   0xe   : > { %s518_s23 = sshll.u32 %s813_s15, 11  ;;  %s823_s28 = smov [#allocation5]  }
   0xf   : > { %s1094_s22 = scalar_select %p896_p6, 1, 0 }
  0x10   : > { %p902_p8 = pnand %p503_p5, %p158_p7  ;;  %s909_s27 = scalar_lea.hbm %s1086_s1, %s518_s23 }
  0x11   : > { %s174_s29 = sshll.u32 %s823_s28, 4  ;;  %s506_s4 = sshll.u32 %s813_s15, 4  ;;  %s913_s29 = int_to_ptr.vmem [resolvable:$true] %s174_s29 }
  0x12   : > { %s1095_s24 = scalar_select %p902_p8, 1, 0 }
  0x13   : > { %p580_p9 = pneg %p902_p8  ;;  %s925_s7 = scalar_lea.hbm %s1087_s2, %s506_s4 }
  0x14   : > { %s824_s8 = smov [#allocation7]   ;;  %s653_s10 = scalar_lea.hbm %s909_s27, 2048 }
  0x15   : > { %p917_p10 = pnand %p580_p9, %p891_p4  ;;  %s191_s9 = sshll.u32 %s824_s8, 4  ;;  %s192_s9 = int_to_ptr.vmem [resolvable:$true] %s191_s9 }
  0x16   : > { %p654_p11 = scmp.ne.s32.totalorder %s909_s27, %s653_s10  ;;  %s658_s19 = scalar_lea.hbm %s1086_s1, 8192 }
  0x17   : > { %p655_p12 = pneg %p917_p10  ;;  %p659_p1 = scmp.lt.s32.totalorder %s909_s27, %s1086_s1 }
  0x18   : > { %p660_p3 = scmp.lt.s32.totalorder %s658_s19, %s653_s10 }
  0x19   : > { %p656_p13 = pnand %p655_p12, %p654_p11 }
  0x1a   : > { %p661_p5 = por %p660_p3, %p659_p1 }
  0x1b   : > { %p657_p0 = pneg %p656_p13 }
  0x1d   : > { %p662_p7 = pnand %p661_p5, %p657_p0 }
  0x1f   : > { %665 = shalt.err (!%p662_p7)
}
  0x20   : > { %s666_s26 = scalar_lea.vmem %s913_s29, 2048  ;;  %p674_p6 = scmp.lt.s32.totalorder %s913_s29, %s913_s29 }
  0x21   : > { %p667_p9 = scmp.ne.s32.totalorder %s913_s29, %s666_s26  ;;  %p675_p4 = scmp.lt.s32.totalorder %s666_s26, %s666_s26 }
  0x23   : > { %p669_p11 = pnand %p667_p9, %p655_p12  ;;  %p676_p8 = por %p675_p4, %p674_p6 }
  0x25   : > { %p670_p13 = pneg %p669_p11 }
  0x27   : > { %p677_p2 = pnand %p676_p8, %p670_p13 }
  0x29   : > { %680 = shalt.err (!%p677_p2)
}
  0x2a   : > { %s825_s28 = smov 128   ;;  %s826_s4 = smov 8  }
  0x2b   : > { %583 = dma.hbm_to_vmem [thread:$0]  (!%p917_p10), %s909_s27, 2048, %s913_s29, [#allocation6], %s825_s28, %s825_s28, %s826_s4  }
  0x2c   : > { %s681_s5 = scalar_lea.hbm %s925_s7, 16  ;;  %s686_s10 = scalar_lea.hbm %s1087_s2, 64 }
  0x2d   : > { %p682_p0 = scmp.ne.s32.totalorder %s925_s7, %s681_s5  ;;  %p687_p6 = scmp.lt.s32.totalorder %s925_s7, %s1087_s2 }
  0x2e   : > { %p688_p8 = scmp.lt.s32.totalorder %s686_s10, %s681_s5 }
  0x2f   : > { %p684_p2 = pnand %p682_p0, %p655_p12 }
  0x30   : > { %p689_p1 = por %p688_p8, %p687_p6 }
  0x31   : > { %p685_p4 = pneg %p684_p2 }
  0x33   : > { %p690_p3 = pnand %p689_p1, %p685_p4 }
  0x35   : > { %693 = shalt.err (!%p690_p3)
}
  0x36   : > { %s694_s27 = scalar_lea.vmem %s192_s9, 16  ;;  %s701_s29 = scalar_lea.vmem %s192_s9, 32 }
  0x37   : > { %p695_p5 = scmp.ne.s32.totalorder %s192_s9, %s694_s27  ;;  %p702_p11 = scmp.lt.s32.totalorder %s192_s9, %s192_s9 }
  0x38   : > { %p703_p13 = scmp.lt.s32.totalorder %s701_s29, %s694_s27 }
  0x39   : > { %p697_p7 = pnand %p695_p5, %p655_p12 }
  0x3a   : > { %p704_p0 = por %p703_p13, %p702_p11 }
  0x3b   : > { %p698_p9 = pneg %p697_p7 }
  0x3d   : > { %p705_p2 = pnand %p704_p0, %p698_p9 }
  0x3f   : > { %708 = shalt.err (!%p705_p2)
}
  0x40   : > { %586 = dma.hbm_to_vmem [thread:$0]  (!%p917_p10), %s925_s7, 16, %s192_s9, [#allocation6]  }
  0x41   : > { %s48_s19 = sadd.s32 1, %s809_s14  ;;  %s39_s23 = sadd.s32 1, %s817_s16 }
  0x42   : > { %p55_p12 = scmp.ne.s32.totalorder %s809_s14, %s805_s13  ;;  %p41_p4 = scmp.ge.s32.totalorder %s39_s23, 4 }
  0x43   : > { %p56_p6 = scmp.eq.s32.totalorder %s821_s17, 0  ;;  %p1097_p8 = scmp.ne.s32.totalorder %s1092_s20, 0 }
  0x44   : > { %p595_p3 = scmp.lt.s32.totalorder %s821_s17, 4  ;;  %s1109_s23 = smov (%p41_p4, %s39_s23), 0 }
  0x45   : > { %p980_p1 = por %p1097_p8, %p55_p12  ;;  %p57_p5 = por %p56_p6, %p55_p12 }
  0x46   : > { %s202_s25 = sand.u32 1, %s809_s14   ;;  %s44_s26 = ssub.s32 %s817_s16, %s1109_s23 }
  0x47   : > { %p46_p7 = scmp.eq.s32.totalorder %s44_s26, 0  ;;  %s508_s7 = sshll.u32 %s202_s25, 4 }
  0x48   : > { %s509_s9 = sshll.u32 %s817_s16, 7  ;;  %s206_s10 = scalar_lea.vmem [#allocation2], %s508_s7 }
  0x49   : > { %s992_s5 = scalar_select %p46_p7, %s809_s14, %s48_s19  }
  0x4a   : > { %s214_s20 = scalar_lea.hbm %s1085_s0, %s509_s9  ;;  %s215_s11 = sshll.u32 %s206_s10, 4  ;;  %s216_s11 = int_to_ptr.vmem [resolvable:$true] %s215_s11 }
  0x4b   : > { %p999_p10 = pnand %p595_p3, %p57_p5  ;;  %s203_s27 = scalar_lea.sflag [#allocation3], %s202_s25 }
  0x4c   : > { %s722_s29 = scalar_lea.vmem %s216_s11, 256  ;;  %s827_s19 = smov [#allocation2]  }
  0x4d   : > { %p711_p9 = pneg %p999_p10  ;;  %p723_p11 = scmp.ne.s32.totalorder %s216_s11, %s722_s29 }
  0x4e   : > { %s727_s26 = sshll.u32 %s827_s19, 4  ;;  %s728_s26 = int_to_ptr.vmem [resolvable:$false] %s727_s26 }
  0x4f   : > { %p725_p13 = pnand %p723_p11, %p711_p9  ;;  %s729_s9 = scalar_lea.vmem %s728_s26, 512 }
  0x50   : > { %p730_p2 = scmp.lt.s32.totalorder %s216_s11, %s728_s26  ;;  %p731_p12 = scmp.lt.s32.totalorder %s729_s9, %s722_s29 }
  0x51   : > { %p726_p0 = pneg %p725_p13 }
  0x52   : > { %p732_p4 = por %p731_p12, %p730_p2 }
  0x54   : > { %p733_p6 = pnand %p732_p4, %p726_p0 }
  0x56   : > { %736 = shalt.err (!%p733_p6)
}
  0x57   : > { %s828_s7 = smov 512   ;;  %p1100_p8 = scmp.ne.s32.totalorder %s1095_s24, 0 }
  0x58   : > { %590 = dma.hbm_to_vmem [thread:$0]  (!%p999_p10), %s214_s20, 256, %s216_s11, %s203_s27, %s828_s7, %s825_s28, %s826_s4  }
  0x59   : > { %227 = sbr.rel (%p1100_p8) target bundleno = 342 (0x156), region = 32  ;;  %s1012_s25 = sand.u32 (!%p1100_p8), 1, %s805_s13  }
  0x5a   : > { %s511_s6 = sshll.u32 (!%p1100_p8), %s1012_s25, 4  ;;  %s230_s8 = scalar_lea.sflag (!%p1100_p8), [#allocation3], %s1012_s25 }
  0x5b   : > { %s1018_s10 = scalar_lea.vmem (!%p1100_p8), [#allocation2], %s511_s6  ;;  %p1101_p3 = scmp.ne.s32.totalorder (!%p1100_p8), %s1093_s21, 0 }
  0x5e   : > { %788 = dma.done.wait (%p1101_p3), %s230_s8, 256  }
  0x5f   : > { %790 = vsyncadd (%p1101_p3), %s230_s8, 4294967040 }
  0x60   : > { %792 = dma.done.wait (%p1101_p3), [#allocation6], 2064  }
  0x61   : > { %794 = vsyncadd (%p1101_p3), [#allocation6], 4294965232  ;;  %v284_v0 = vld [vmem:[#allocation5 + $0x78] sm:$0xff]  ;;  %v283_v1 = vld [vmem:[#allocation5 + $0x70] sm:$0xff]  ;;  %s263_s21 = scalar_lea.vmem [#allocation8], %s511_s6  ;;  %s515_s28 = sshll.u32 %s813_s15, 7 }
  0x62   : > { %537 = vmatprep.subr.mxu0 %v284_v0  ;;  %v282_v2 = vld [vmem:[#allocation5 + $0x68] sm:$0xff]  ;;  %v281_v3 = vld [vmem:[#allocation5 + $0x60] sm:$0xff]  ;;  %v280_v5 = vld [vmem:[#allocation5 + $0x58] sm:$0xff]  ;;  %s386_s24 = sshll.u32 %s263_s21, 4  ;;  %s1038_s11 = scalar_lea.hbm %s1088_s3, %s515_s28  ;;  %s1033_s24 = int_to_ptr.vmem [resolvable:$true] %s386_s24 }
  0x63   : > { %538 = vmatpush3.msra.mxu0 %v284_v0  ;;  %v267_v4 = vld [vmem:[%s1018_s10] sm:$0xff]  ;;  %v278_v7 = vld [vmem:[#allocation5 + $0x48] sm:$0xff]  ;;  %v276_v9 = vld [vmem:[#allocation5 + $0x38] sm:$0xff]  ;;  %s370_s18 = scalar_lea.sflag [#allocation4], %s1012_s25  ;;  %s737_s27 = scalar_lea.vmem %s1033_s24, 256 }
  0x64   : > { %539 = vmatprep.subr.mxu0 %v283_v1  ;;  %569 = vmatprep.mubr.f32.mxu0 %v267_v4  ;;  %v279_v6 = vld [vmem:[#allocation5 + $0x50] sm:$0xff]  ;;  %v277_v8 = vld [vmem:[#allocation5 + $0x40] sm:$0xff]  ;;  %v274_v11 = vld [vmem:[#allocation5 + $0x28] sm:$0xff]  ;;  %p738_p5 = scmp.ne.s32.totalorder %s1033_s24, %s737_s27  ;;  %s829_s15 = smov [#allocation8]  }
  0x65   : > { %540 = vmatpush3.msra.mxu0 %v283_v1  ;;  %v275_v10 = vld [vmem:[#allocation5 + $0x30] sm:$0xff]  ;;  %v273_v12 = vld [vmem:[#allocation5 + $0x20] sm:$0xff]  ;;  %v272_v13 = vld [vmem:[#allocation5 + $0x18] sm:$0xff]  ;;  %s741_s29 = sshll.u32 %s829_s15, 4  ;;  %s742_s29 = int_to_ptr.vmem [resolvable:$false] %s741_s29 }
  0x66   : > { %541 = vmatprep.subr.mxu0 %v282_v2  ;;  %v271_v14 = vld [vmem:[#allocation5 + $0x10] sm:$0xff]  ;;  %v270_v15 = vld [vmem:[#allocation5 + $0x8] sm:$0xff]  ;;  %v269_v16 = vld [vmem:[#allocation5] sm:$0xff]  ;;  %p739_p7 = pnand %p738_p5, %p980_p1  ;;  %s743_s19 = scalar_lea.vmem %s742_s29, 512 }
  0x67   : > { %542 = vmatpush3.msra.mxu0 %v282_v2  ;;  %v268_v17 = vld [vmem:[%s1018_s10 + $0x8] sm:$0xff]  ;;  %v513_v18 = vld [vmem:[#allocation7] ss:$0 sm:$0xff]  ;;  %p744_p9 = scmp.lt.s32.totalorder %s1033_s24, %s742_s29  ;;  %p745_p11 = scmp.lt.s32.totalorder %s743_s19, %s737_s27 }
  0x68   : > { %543 = vmatprep.subr.mxu0 %v281_v3  ;;  %p740_p10 = pneg %p739_p7 }
  0x69   : > { %544 = vmatpush3.msra.mxu0 %v281_v3  ;;  %p746_p13 = por %p745_p11, %p744_p9 }
  0x6a   : > { %545 = vmatprep.subr.mxu0 %v280_v5 }
  0x6b   : > { %546 = vmatpush3.msra.mxu0 %v280_v5  ;;  %p747_p0 = pnand %p746_p13, %p740_p10 }
  0x6c   : > { %547 = vmatprep.subr.mxu0 %v279_v6 }
  0x6d   : > { %548 = vmatpush3.msra.mxu0 %v279_v6 }
  0x6e   : > { %549 = vmatprep.subr.mxu0 %v278_v7 }
  0x6f   : > { %550 = vmatpush3.msra.mxu0 %v278_v7 }
  0x70   : > { %551 = vmatprep.subr.mxu0 %v277_v8 }
  0x71   : > { %552 = vmatpush3.msra.mxu0 %v277_v8 }
  0x72   : > { %553 = vmatprep.subr.mxu0 %v276_v9 }
  0x73   : > { %554 = vmatpush3.msra.mxu0 %v276_v9 }
  0x74   : > { %555 = vmatprep.subr.mxu0 %v275_v10 }
  0x75   : > { %556 = vmatpush3.msra.mxu0 %v275_v10 }
  0x76   : > { %557 = vmatprep.subr.mxu0 %v274_v11 }
  0x77   : > { %558 = vmatpush3.msra.mxu0 %v274_v11 }
  0x78   : > { %559 = vmatprep.subr.mxu0 %v273_v12 }
  0x79   : > { %560 = vmatpush3.msra.mxu0 %v273_v12 }
  0x7a   : > { %561 = vmatprep.subr.mxu0 %v272_v13 }
  0x7b   : > { %562 = vmatpush3.msra.mxu0 %v272_v13 }
  0x7c   : > { %563 = vmatprep.subr.mxu0 %v271_v14 }
  0x7d   : > { %564 = vmatpush3.msra.mxu0 %v271_v14 }
  0x7e   : > { %565 = vmatprep.subr.mxu0 %v270_v15 }
  0x7f   : > { %566 = vmatpush3.msra.mxu0 %v270_v15 }
  0x80   : > { %567 = vmatprep.subr.mxu0 %v269_v16 }
  0x81   : > { %568 = vmatpush3.msra.mxu0 %v269_v16 }
  0x82   : > { %570 = vmatmul.mubr.f32.vlgmr.msra.gmra.mxu0 %v268_v17 }
 0x142   : > { %v571_v19 = vpop.f32.mrf.mxu0 }
 0x143   : > { %v364_v20 = vadd.f32 %v571_v19, %v513_v18 }
 0x144   : > { %v358_v21 = vpop.f32.mrf.mxu0 }
 0x145   : > { %368 = vst [vmem:[%s263_s21 + $0x8] sm:$0xff] %v364_v20  ;;  %v359_v22 = vadd.f32 %v513_v18, %v358_v21 }
 0x147   : > { %367 = vst [vmem:[%s263_s21] sm:$0xff] %v359_v22 }
 0x148   : > { %750 = shalt.err (!%p747_p0)
}
 0x149   : > { %s751_s26 = scalar_lea.hbm %s1038_s11, 256  ;;  %s755_s6 = scalar_lea.hbm %s1088_s3, 1024 }
 0x14a   : > { %p752_p2 = scmp.ne.s32.totalorder %s1038_s11, %s751_s26  ;;  %p756_p6 = scmp.lt.s32.totalorder %s1038_s11, %s1088_s3 }
 0x14b   : > { %p757_p8 = scmp.lt.s32.totalorder %s755_s6, %s751_s26 }
 0x14c   : > { %p753_p12 = pnand %p752_p2, %p980_p1 }
 0x14d   : > { %p758_p3 = por %p757_p8, %p756_p6 }
 0x14e   : > { %p754_p4 = pneg %p753_p12 }
 0x150   : > { %p759_p5 = pnand %p758_p3, %p754_p4 }
 0x152   : > { %762 = shalt.err (!%p759_p5)
}
 0x153   : > { %s830_s21 = smov 128   ;;  %s831_s28 = smov 512  }
 0x154   : > { %s832_s4 = smov 8  }
 0x155   : > { %578 = dma.vmem_to_hbm [thread:$0]  (%p980_p1), %s1033_s24, 256, %s1038_s11, %s370_s18, %s830_s21, %s831_s28, %s832_s4  }
 0x156 PF: > { %p596_p7 = scmp.ge.s32.totalorder %s821_s17, 2  ;;  %s401_s20 = sand.u32 1, %s801_s12  }
 0x157   : > { %p1102_p10 = scmp.ne.s32.totalorder %s1094_s22, 0  ;;  %s402_s27 = scalar_lea.sflag [#allocation4], %s401_s20 }
 0x159   : > { %p592_p9 = pnand %p596_p7, %p1102_p10 }
 0x15b   : > { %p593_p11 = pneg %p592_p9 }
 0x15d   : > { %796 = dma.done.wait (%p593_p11), %s402_s27, 256  }
 0x15e   : > { %798 = vsyncadd (%p593_p11), %s402_s27, 4294967040  ;;  %s20_s17 = sadd.s32 1, %s821_s17   ;;  %s1103_s12 = smov %s805_s13 }
 0x15f   : > { %p17_p13 = scmp.ge.s32.totalorder %s20_s17, 6   ;;  %s1104_s13 = smov %s809_s14 }
 0x160   : > { %s1105_s14 = smov %s992_s5  ;;  %s1106_s15 = smov %s817_s16 }
 0x161   : > { %s1107_s16 = smov %s1109_s23  ;;  %19 = sbr.rel (!%p17_p13) target bundleno = 7 (0x7), region = 87 }
 0x166   :  { %407 = vsyncpa [#allocation3], 1 }
 0x167   :  { %409 = vsyncpa [#allocation3 + $0x1], 1 }
 0x168   :  { %410 = vsyncpa [#allocation6], 1 }
 0x169   :  { %411 = vsyncpa [#allocation4], 1 }
 0x16a   :  { %413 = vsyncpa [#allocation4 + $0x1], 1 }

// kernel: tpu_custom_call.1
= control target key start
LH: loop header
LB: loop body
LE: loop exit
PB: predicated region body
PF: predicated region fallthrough
CT: control target
= control target key end

     0   :  { %s1114_s0 = inlined_call_operand.hbm [shape: f32[16,512], index: 0, kind: input, shape index: {}]   ;;  %s1115_s1 = inlined_call_operand.hbm [shape: f32[4,128,128], index: 1, kind: input, shape index: {}]   ;;  %s1116_s2 = inlined_call_operand.hbm [shape: f32[4,1,128], index: 2, kind: input, shape index: {}]   ;;  %s1117_s3 = inlined_call_operand.hbm [shape: f32[16,512], index: 3, kind: output, shape index: {}]  }
   0x1   :  { %1121 = sst [smem:[#allocation15_spill]] %s1114_s0 }
   0x2   :  { %1122 = sst [smem:[#allocation16_spill]] %s1115_s1 }
   0x3   :  { %8 = vsyncpa [#allocation3], 0 }
   0x4   :  { %10 = vsyncpa [#allocation3 + $0x1], 0 }
   0x5   :  { %11 = vsyncpa [#allocation6], 0 }
   0x6   :  { %13 = vsyncpa [#allocation6 + $0x1], 0 }
   0x7   :  { %14 = vsyncpa [#allocation4], 0 }
   0x8   :  { %16 = vsyncpa [#allocation4 + $0x1], 0  ;;  %s898_s12 = smov 0   ;;  %s900_s13 = smov 0  }
   0x9   :  { %s902_s14 = smov 0   ;;  %s904_s15 = smov 0  }
   0xa   :  { %s906_s16 = smov 0   ;;  %s908_s17 = smov 0  }
   0xb LB: > { %1123 = sst [smem:[#allocation12_spill]] %s854_s14  ;;  %s929_s18 = sadd.s32 4294967295, %s866_s17   ;;  %s866_s17 = sphi %s908_s17, %s22_s17   ;;  %s862_s16 = sphi %s906_s16, %s1140_s16   ;;  %s858_s15 = sphi %s904_s15, %s1139_s15   ;;  %s854_s14 = sphi %s902_s14, %s1135_s14   ;;  %s850_s13 = sphi %s900_s13, %s1138_s13   ;;  %s846_s12 = sphi %s898_s12, %s1137_s12  }
   0xc   : > { %s548_s19 = sadd.s32 4294967294, %s866_s17   ;;  %s41_s20 = sadd.s32 1, %s862_s16 }
   0xd   : > { %s50_s21 = sadd.s32 1, %s854_s14  ;;  %p43_p0 = scmp.ge.s32.totalorder %s41_s20, 4 }
   0xe   : > { %p57_p1 = scmp.ne.s32.totalorder %s854_s14, %s850_s13  ;;  %p58_p2 = scmp.eq.s32.totalorder %s866_s17, 0 }
   0xf   : > { %p63_p3 = scmp.ne.s32.totalorder %s850_s13, %s846_s12  ;;  %s1142_s20 = smov (%p43_p0, %s41_s20), 0 }
  0x10   : > { %1124 = sst [smem:[#allocation13_spill]] %s1142_s20  ;;  %p59_p4 = por %p58_p2, %p57_p1 }
  0x11   : > { %p64_p5 = scmp.eq.s32.totalorder %s929_s18, 0  ;;  %s46_s22 = ssub.s32 %s862_s16, %s1142_s20 }
  0x12   : > { %p147_p6 = scmp.eq.s32.totalorder %s929_s18, 3  ;;  %p48_p7 = scmp.eq.s32.totalorder %s46_s22, 0 }
  0x13   : > { %p945_p8 = por %p64_p5, %p63_p3  ;;  %p153_p10 = scmp.eq.s32.totalorder %s548_s19, 3 }
  0x14   : > { %p949_p9 = por %p147_p6, %p57_p1  ;;  %p642_p12 = scmp.lt.s32.totalorder %s866_s17, 4 }
  0x15   : > { %s954_s25 = scalar_select %p48_p7, %s854_s14, %s50_s21  }
  0x16   : > { %p956_p11 = por %p153_p10, %p63_p3  ;;  %s962_s27 = sand.u32 1, %s854_s14  }
  0x17   : > { %1127 = sst [smem:[#allocation14_spill]] %s954_s25  ;;  %p964_p13 = pnand %p642_p12, %p59_p4 }
  0x18   : > { %s196_s29 = sand.u32 1, %s866_s17   ;;  %s553_s30 = sshll.u32 %s962_s27, 7 }
  0x19   : > { %s566_s4 = sshll.u32 %s862_s16, 11  ;;  %s200_s5 = scalar_lea.vmem [#allocation5], %s553_s30 }
  0x1a   : > { %s208_s6 = sshll.u32 %s200_s5, 4  ;;  %s1130_s1 = sld [smem:[#allocation16_spill]]  ;;  %s209_s6 = int_to_ptr.vmem [resolvable:$true] %s208_s6 }
  0x1b   : > { %s974_s10 = scalar_lea.sflag [#allocation6], %s196_s29  ;;  %p700_p0 = pneg %p964_p13 }
  0x1c   : > { %s711_s11 = scalar_lea.vmem %s209_s6, 2048  ;;  %s868_s19 = smov [#allocation5]  }
  0x1d   : > { %p712_p1 = scmp.ne.s32.totalorder %s209_s6, %s711_s11  ;;  %s716_s21 = sshll.u32 %s868_s19, 4  ;;  %s717_s21 = int_to_ptr.vmem [resolvable:$false] %s716_s21 }
  0x1e   : > { %s718_s22 = scalar_lea.vmem %s717_s21, 4096  ;;  %p719_p4 = scmp.lt.s32.totalorder %s209_s6, %s717_s21 }
  0x1f   : > { %p714_p2 = pnand %p712_p1, %p700_p0  ;;  %p720_p5 = scmp.lt.s32.totalorder %s718_s22, %s711_s11 }
  0x20   : > { %s207_s9 = scalar_lea.hbm %s1130_s1, %s566_s4 }
  0x21   : > { %p715_p3 = pneg %p714_p2  ;;  %p721_p6 = por %p720_p5, %p719_p4 }
  0x23   : > { %p722_p7 = pnand %p721_p6, %p715_p3 }
  0x25   : > { %725 = shalt.err (!%p722_p7)
}
  0x26   : > { %s1119_s30 = smov 128   ;;  %s870_s29 = smov 8  }
  0x27   : > { %634 = dma.hbm_to_vmem [thread:$0]  (!%p964_p13), %s207_s9, 2048, %s209_s6, %s974_s10, %s1119_s30, %s1119_s30, %s870_s29  }
  0x28   : > { %p557_p10 = scmp.ge.s32.totalorder %s866_s17, 1  ;;  %p234_p12 = scmp.lt.s32.totalorder %s866_s17, 5 }
  0x29   : > { %s551_s5 = sshll.u32 %s962_s27, 4  ;;  %s552_s7 = sshll.u32 %s862_s16, 7 }
  0x2a   : > { %p989_p1 = pnand %p557_p10, %p234_p12  ;;  %s1132_s0 = sld [smem:[#allocation15_spill]] }
  0x2b   : > { %s177_s21 = scalar_lea.vmem [#allocation2], %s551_s5  ;;  %s174_s1 = scalar_lea.sflag [#allocation3], %s962_s27 }
  0x2c   : > { %s186_s22 = sshll.u32 %s177_s21, 4  ;;  %s871_s6 = smov [#allocation2]   ;;  %s187_s22 = int_to_ptr.vmem [resolvable:$true] %s186_s22 }
  0x2d   : > { %s739_s20 = scalar_lea.vmem %s187_s22, 256  ;;  %s744_s9 = sshll.u32 %s871_s6, 4  ;;  %s745_s9 = int_to_ptr.vmem [resolvable:$false] %s744_s9 }
  0x2e   : > { %p740_p2 = scmp.ne.s32.totalorder %s187_s22, %s739_s20  ;;  %s746_s30 = scalar_lea.vmem %s745_s9, 512 }
  0x2f   : > { %p747_p5 = scmp.lt.s32.totalorder %s187_s22, %s745_s9  ;;  %p748_p6 = scmp.lt.s32.totalorder %s746_s30, %s739_s20 }
  0x30   : > { %s185_s19 = scalar_lea.hbm %s1132_s0, %s552_s7  ;;  %p742_p3 = pnand %p740_p2, %p700_p0 }
  0x31   : > { %p749_p7 = por %p748_p6, %p747_p5 }
  0x32   : > { %p743_p4 = pneg %p742_p3 }
  0x34   : > { %p750_p10 = pnand %p749_p7, %p743_p4 }
  0x36   : > { %753 = shalt.err (!%p750_p10)
}
  0x37   : > { %s872_s7 = smov 512   ;;  %s1133_s5 = smov 128  }
  0x38   : > { %631 = dma.hbm_to_vmem [thread:$0]  (!%p964_p13), %s185_s19, 256, %s187_s22, %s174_s1, %s872_s7, %s1133_s5, %s870_s29  }
  0x39   : > { %s556_s8 = sshll.u32 %s862_s16, 4  ;;  %s221_s11 = scalar_lea.vmem [#allocation7], %s962_s27 }
  0x3a   : > { %s229_s21 = sshll.u32 %s221_s11, 4  ;;  %s227_s9 = scalar_lea.hbm %s1116_s2, %s556_s8  ;;  %s230_s21 = int_to_ptr.vmem [resolvable:$true] %s229_s21 }
  0x3b   : > { %s767_s20 = scalar_lea.vmem %s230_s21, 16  ;;  %s873_s30 = smov [#allocation7]  }
  0x3c   : > { %p768_p12 = scmp.ne.s32.totalorder %s230_s21, %s767_s20  ;;  %s772_s25 = sshll.u32 %s873_s30, 4  ;;  %s773_s25 = int_to_ptr.vmem [resolvable:$false] %s772_s25 }
  0x3d   : > { %s774_s14 = scalar_lea.vmem %s773_s25, 32  ;;  %p775_p4 = scmp.lt.s32.totalorder %s230_s21, %s773_s25 }
  0x3e   : > { %p770_p2 = pnand %p768_p12, %p700_p0  ;;  %p776_p5 = scmp.lt.s32.totalorder %s774_s14, %s767_s20 }
  0x40   : > { %p771_p3 = pneg %p770_p2  ;;  %p777_p6 = por %p776_p5, %p775_p4 }
  0x42   : > { %p778_p7 = pnand %p777_p6, %p771_p3 }
  0x44   : > { %781 = shalt.err (!%p778_p7)
}
  0x45   : > { %637 = dma.hbm_to_vmem [thread:$0]  (!%p964_p13), %s227_s9, 16, %s230_s21, %s974_s10  }
  0x46   : > { %238 = sbr.rel (%p989_p1) target bundleno = 324 (0x144), region = 32  ;;  %s1020_s0 = sand.u32 (!%p989_p1), 1, %s850_s13  }
  0x47   : > { %s558_s1 = sshll.u32 (!%p989_p1), %s1020_s0, 4  ;;  %s241_s25 = scalar_lea.sflag (!%p989_p1), [#allocation3], %s1020_s0 }
  0x48   : > { %s1026_s14 = scalar_lea.vmem (!%p989_p1), [#allocation2], %s558_s1 }
  0x4b   : > { %833 = dma.done.wait (%p945_p8), %s241_s25, 256  }
  0x4c   : > { %835 = vsyncadd (%p945_p8), %s241_s25, 4294967040  ;;  %s249_s27 = sand.u32 1, %s929_s18   ;;  %s559_s28 = sshll.u32 %s1020_s0, 7 }
  0x4d   : > { %s250_s10 = scalar_lea.sflag [#allocation6], %s249_s27  ;;  %s1034_s29 = scalar_lea.vmem [#allocation5], %s559_s28 }
  0x4e   : > { %837 = dma.done.wait (%p945_p8), %s250_s10, 2064  }
  0x4f   : > { %839 = vsyncadd (%p945_p8), %s250_s10, 4294965232  ;;  %v313_v0 = vld [vmem:[%s1034_s29 + $0x78] sm:$0xff]  ;;  %v312_v1 = vld [vmem:[%s1034_s29 + $0x70] sm:$0xff]  ;;  %s261_s18 = scalar_lea.vmem [#allocation7], %s1020_s0  ;;  %s292_s23 = scalar_lea.vmem [#allocation8], %s558_s1 }
  0x50   : > { %585 = vmatprep.subr.mxu0 %v313_v0  ;;  %v311_v2 = vld [vmem:[%s1034_s29 + $0x68] sm:$0xff]  ;;  %v310_v3 = vld [vmem:[%s1034_s29 + $0x60] sm:$0xff]  ;;  %v309_v5 = vld [vmem:[%s1034_s29 + $0x58] sm:$0xff]  ;;  %s415_s4 = sshll.u32 %s292_s23, 4  ;;  %s563_s19 = sshll.u32 %s858_s15, 7  ;;  %s1062_s4 = int_to_ptr.vmem [resolvable:$true] %s415_s4 }
  0x51   : > { %586 = vmatpush3.msra.mxu0 %v313_v0  ;;  %v296_v4 = vld [vmem:[%s1026_s14] sm:$0xff]  ;;  %v307_v7 = vld [vmem:[%s1034_s29 + $0x48] sm:$0xff]  ;;  %v305_v9 = vld [vmem:[%s1034_s29 + $0x38] sm:$0xff]  ;;  %s1067_s5 = scalar_lea.hbm %s1117_s3, %s563_s19  ;;  %s399_s8 = scalar_lea.sflag [#allocation4], %s1020_s0 }
  0x52   : > { %587 = vmatprep.subr.mxu0 %v312_v1  ;;  %617 = vmatprep.mubr.f32.mxu0 %v296_v4  ;;  %v308_v6 = vld [vmem:[%s1034_s29 + $0x50] sm:$0xff]  ;;  %v306_v8 = vld [vmem:[%s1034_s29 + $0x40] sm:$0xff]  ;;  %v303_v11 = vld [vmem:[%s1034_s29 + $0x28] sm:$0xff]  ;;  %s782_s11 = scalar_lea.vmem %s1062_s4, 256  ;;  %s874_s15 = smov [#allocation8]  }
  0x53   : > { %588 = vmatpush3.msra.mxu0 %v312_v1  ;;  %v304_v10 = vld [vmem:[%s1034_s29 + $0x30] sm:$0xff]  ;;  %v302_v12 = vld [vmem:[%s1034_s29 + $0x20] sm:$0xff]  ;;  %v301_v13 = vld [vmem:[%s1034_s29 + $0x18] sm:$0xff]  ;;  %p783_p8 = scmp.ne.s32.totalorder %s1062_s4, %s782_s11  ;;  %s786_s21 = sshll.u32 %s874_s15, 4  ;;  %s787_s21 = int_to_ptr.vmem [resolvable:$false] %s786_s21 }
  0x54   : > { %589 = vmatprep.subr.mxu0 %v311_v2  ;;  %v300_v14 = vld [vmem:[%s1034_s29 + $0x10] sm:$0xff]  ;;  %v299_v15 = vld [vmem:[%s1034_s29 + $0x8] sm:$0xff]  ;;  %v298_v16 = vld [vmem:[%s1034_s29] sm:$0xff]  ;;  %s788_s6 = scalar_lea.vmem %s787_s21, 512  ;;  %p789_p1 = scmp.lt.s32.totalorder %s1062_s4, %s787_s21 }
  0x55   : > { %590 = vmatpush3.msra.mxu0 %v311_v2  ;;  %v297_v17 = vld [vmem:[%s1026_s14 + $0x8] sm:$0xff]  ;;  %v561_v18 = vld [vmem:[%s261_s18] ss:$0 sm:$0xff]  ;;  %p784_p13 = pnand %p783_p8, %p949_p9  ;;  %p790_p10 = scmp.lt.s32.totalorder %s788_s6, %s782_s11 }
  0x56   : > { %591 = vmatprep.subr.mxu0 %v310_v3 }
  0x57   : > { %592 = vmatpush3.msra.mxu0 %v310_v3  ;;  %p785_p0 = pneg %p784_p13  ;;  %p791_p12 = por %p790_p10, %p789_p1 }
  0x58   : > { %593 = vmatprep.subr.mxu0 %v309_v5 }
  0x59   : > { %594 = vmatpush3.msra.mxu0 %v309_v5  ;;  %p792_p2 = pnand %p791_p12, %p785_p0 }
  0x5a   : > { %595 = vmatprep.subr.mxu0 %v308_v6 }
  0x5b   : > { %596 = vmatpush3.msra.mxu0 %v308_v6 }
  0x5c   : > { %597 = vmatprep.subr.mxu0 %v307_v7 }
  0x5d   : > { %598 = vmatpush3.msra.mxu0 %v307_v7 }
  0x5e   : > { %599 = vmatprep.subr.mxu0 %v306_v8 }
  0x5f   : > { %600 = vmatpush3.msra.mxu0 %v306_v8 }
  0x60   : > { %601 = vmatprep.subr.mxu0 %v305_v9 }
  0x61   : > { %602 = vmatpush3.msra.mxu0 %v305_v9 }
  0x62   : > { %603 = vmatprep.subr.mxu0 %v304_v10 }
  0x63   : > { %604 = vmatpush3.msra.mxu0 %v304_v10 }
  0x64   : > { %605 = vmatprep.subr.mxu0 %v303_v11 }
  0x65   : > { %606 = vmatpush3.msra.mxu0 %v303_v11 }
  0x66   : > { %607 = vmatprep.subr.mxu0 %v302_v12 }
  0x67   : > { %608 = vmatpush3.msra.mxu0 %v302_v12 }
  0x68   : > { %609 = vmatprep.subr.mxu0 %v301_v13 }
  0x69   : > { %610 = vmatpush3.msra.mxu0 %v301_v13 }
  0x6a   : > { %611 = vmatprep.subr.mxu0 %v300_v14 }
  0x6b   : > { %612 = vmatpush3.msra.mxu0 %v300_v14 }
  0x6c   : > { %613 = vmatprep.subr.mxu0 %v299_v15 }
  0x6d   : > { %614 = vmatpush3.msra.mxu0 %v299_v15 }
  0x6e   : > { %615 = vmatprep.subr.mxu0 %v298_v16 }
  0x6f   : > { %616 = vmatpush3.msra.mxu0 %v298_v16 }
  0x70   : > { %618 = vmatmul.mubr.f32.vlgmr.msra.gmra.mxu0 %v297_v17 }
 0x130   : > { %v619_v19 = vpop.f32.mrf.mxu0 }
 0x131   : > { %v393_v20 = vadd.f32 %v619_v19, %v561_v18 }
 0x132   : > { %v387_v21 = vpop.f32.mrf.mxu0 }
 0x133   : > { %397 = vst [vmem:[%s292_s23 + $0x8] sm:$0xff] %v393_v20  ;;  %v388_v22 = vadd.f32 %v561_v18, %v387_v21 }
 0x135   : > { %396 = vst [vmem:[%s292_s23] sm:$0xff] %v388_v22 }
 0x136   : > { %795 = shalt.err (!%p792_p2)
}
 0x137   : > { %s796_s9 = scalar_lea.hbm %s1067_s5, 256  ;;  %s800_s1 = scalar_lea.hbm %s1117_s3, 1024 }
 0x138   : > { %p797_p3 = scmp.ne.s32.totalorder %s1067_s5, %s796_s9  ;;  %p801_p6 = scmp.lt.s32.totalorder %s1067_s5, %s1117_s3 }
 0x139   : > { %p802_p7 = scmp.lt.s32.totalorder %s800_s1, %s796_s9 }
 0x13a   : > { %p798_p4 = pnand %p797_p3, %p949_p9 }
 0x13b   : > { %p803_p8 = por %p802_p7, %p801_p6 }
 0x13c   : > { %p799_p5 = pneg %p798_p4 }
 0x13e   : > { %p804_p13 = pnand %p803_p8, %p799_p5 }
 0x140   : > { %807 = shalt.err (!%p804_p13)
}
 0x141   : > { %s875_s27 = smov 128   ;;  %s876_s28 = smov 512  }
 0x142   : > { %s877_s10 = smov 8  }
 0x143   : > { %626 = dma.vmem_to_hbm [thread:$0]  (%p949_p9), %s1062_s4, 256, %s1067_s5, %s399_s8, %s875_s27, %s876_s28, %s877_s10  }
 0x144 PF: > { %p643_p0 = scmp.ge.s32.totalorder %s866_s17, 2  ;;  %s430_s29 = sand.u32 1, %s846_s12  }
 0x145   : > { %s431_s18 = scalar_lea.sflag [#allocation4], %s430_s29 }
 0x146   : > { %p639_p1 = pnand %p643_p0, %p956_p11 }
 0x148   : > { %p640_p10 = pneg %p639_p1 }
 0x14a   : > { %841 = dma.done.wait (%p640_p10), %s431_s18, 256  }
 0x14b   : > { %843 = vsyncadd (%p640_p10), %s431_s18, 4294967040  ;;  %s22_s17 = sadd.s32 1, %s866_s17   ;;  %s1134_s23 = sld [smem:[#allocation12_spill]] }
 0x14c   : > { %p19_p12 = scmp.ge.s32.totalorder %s22_s17, 6   ;;  %s1135_s14 = sld [smem:[#allocation14_spill]] }
 0x14d   : > { %s1136_s24 = sld [smem:[#allocation13_spill]]  ;;  %s1137_s12 = smov %s850_s13 }
 0x14e   : > { %s1139_s15 = smov %s862_s16 }
 0x14f   :  { %21 = sbr.rel (!%p19_p12) target bundleno = 11 (0xb), region = 101 }
 0x151   : > { %s1138_s13 = smov %s1134_s23 }
 0x153   : > { %s1140_s16 = smov %s1136_s24 }
 0x154   :  { %436 = vsyncpa [#allocation3], 1 }
 0x155   :  { %438 = vsyncpa [#allocation3 + $0x1], 1 }
 0x156   :  { %439 = vsyncpa [#allocation6], 1 }
 0x157   :  { %441 = vsyncpa [#allocation6 + $0x1], 1 }
 0x158   :  { %442 = vsyncpa [#allocation4], 1 }
 0x159   :  { %444 = vsyncpa [#allocation4 + $0x1], 1 }

</bundles_post_ra>
